<compile_context>
chip_gen: v6e
topology: v6e:2x2x1
jax: 0.10.0
libtpu: 0.0.40
codegen_flags: <defaults>
</compile_context>

<pallas_src>
import jax
import jax.numpy as jnp
from jax.experimental import pallas as pl
from jax.experimental.pallas import tpu as pltpu


def lstm_decoder_kernel(x_ref, wih_ref, whh_ref, b_ref, wdec_ref, bdec_ref,
                        out_ref, xproj_scr):
    # Static shapes (Python ints at trace time).
    B = out_ref.shape[0]                 # padded batch (multiple of 8)
    H = whh_ref.shape[0]                 # hidden size
    T = xproj_scr.shape[0] // B          # number of timesteps

    # ---- Hoisted input projection: ONE big MXU matmul over all timesteps ----
    # (T*B, Vin) @ (Vin, 4H) + (1, 4H)  ->  (T*B, 4H), kept resident in VMEM.
    xproj_scr[...] = (jnp.dot(x_ref[...], wih_ref[...],
                              preferred_element_type=jnp.float32)
                      + b_ref[...])

    whh = whh_ref[...]                   # (H, 4H), loaded once

    # ---- Peeled step 0: h0 = c0 = 0  =>  no h@Whh matmul, no f*c term ----
    gates0 = xproj_scr[pl.ds(0, B), :]                      # (B, 4H)
    sig0 = jax.nn.sigmoid(gates0)                           # i|f|o in one EUP pass
    tg0 = jnp.tanh(gates0)                                  # g in one EUP pass
    c1 = sig0[:, 0 * H:1 * H] * tg0[:, 2 * H:3 * H]         # i * g
    h1 = sig0[:, 3 * H:4 * H] * jnp.tanh(c1)                # o * tanh(c)

    # ---- Serial recurrence over the remaining timesteps ----
    # NOTE: for H this small the h@Whh MXU matmul is <1% utilized; a VPU
    # broadcast-FMA alternative may win on v5e/v6e (MRF latency) — benchmark
    # before switching; kept on the MXU here for simplicity/portability.
    def step(t, carry):
        h, c = carry
        row = pl.multiple_of(t * B, B)   # sublane-aligned offset into xproj
        gates = xproj_scr[pl.ds(row, B), :] + jnp.dot(
            h, whh, preferred_element_type=jnp.float32)     # (B, 4H)

        # Merged transcendentals: full-vreg sigmoid + tanh, then lane-slice.
        sig = jax.nn.sigmoid(gates)
        tg = jnp.tanh(gates)
        i_g = sig[:, 0 * H:1 * H]
        f_g = sig[:, 1 * H:2 * H]
        o_g = sig[:, 3 * H:4 * H]
        g_g = tg[:, 2 * H:3 * H]

        c_new = f_g * c + i_g * g_g
        h_new = o_g * jnp.tanh(c_new)
        return h_new, c_new

    unroll = max(1, min(T - 1, 8))       # full unroll at toy T, capped at scale
    h_T, _ = jax.lax.fori_loop(1, T, step, (h1, c1), unroll=unroll)

    # ---- Decoder: Linear(hidden -> output_vocab) applied to h_T ----
    # out_ref is (B_pad, Vout_pad), Vout_pad multiple of 128 -> lane-dense store.
    out_ref[...] = (jnp.dot(h_T, wdec_ref[...],
                            preferred_element_type=jnp.float32)
                    + bdec_ref[...])


def encoder_decoder_forward(inputs, input_mask, params, targets=None):
    """inputs: (B, T, V_in) float32. Returns (B, V_out) float32."""
    del input_mask, targets  # unused, matches the PyTorch forward
    B, T, Vin = inputs.shape
    H = params["w_hh_t"].shape[0]
    Vout = params["w_dec_t"].shape[1]

    B_pad = max(8, ((B + 7) // 8) * 8)          # sublane multiple
    Vout_pad = ((Vout + 127) // 128) * 128      # lane-dense output

    # Zero-pad batch, go time-major, flatten to (T*B_pad, Vin) so the input
    # projection is one big matmul inside the kernel.
    x = jnp.pad(inputs, ((0, B_pad - B), (0, 0), (0, 0)))
    x2d = jnp.transpose(x, (1, 0, 2)).reshape(T * B_pad, Vin)

    # Zero-pad decoder weights/bias along the output dim (sliced away below).
    w_dec = jnp.pad(params["w_dec_t"], ((0, 0), (0, Vout_pad - Vout)))
    b_dec = jnp.pad(params["b_dec"], ((0, 0), (0, Vout_pad - Vout)))

    # Size the scoped-VMEM limit from the actual resident slab (inputs,
    # weights, xproj scratch, output) with 2x headroom, clamped below v7x's
    # 64 MiB physical.  If 2*slab ever exceeds ~32 MiB, switch to a T-chunked
    # grid (chunk axis "arbitrary", h/c carried in VMEM scratch).
    f32 = 4
    slab_elems = (x2d.size + params["w_ih_t"].size + params["w_hh_t"].size
                  + params["b"].size + w_dec.size + b_dec.size
                  + B_pad * Vout_pad + T * B_pad * 4 * H)
    vmem_limit = int(min(max(2 * slab_elems * f32, 16 * 1024 * 1024),
                         60 * 1024 * 1024))

    vmem = pltpu.MemorySpace.VMEM
    out_padded = pl.pallas_call(
        lstm_decoder_kernel,
        out_shape=jax.ShapeDtypeStruct((B_pad, Vout_pad), jnp.float32),
        in_specs=[pl.BlockSpec(memory_space=vmem)] * 6,
        out_specs=pl.BlockSpec(memory_space=vmem),
        scratch_shapes=[pltpu.VMEM((T * B_pad, 4 * H), jnp.float32)],
        compiler_params=pltpu.CompilerParams(vmem_limit_bytes=vmem_limit),
    )(x2d, params["w_ih_t"], params["w_hh_t"], params["b"], w_dec, b_dec)

    return out_padded[:B, :Vout]


def init_params(key, hidden_size, input_vocab_size, output_vocab_size):
    """Deterministic synthetic parameters with PyTorch-LSTM shapes."""
    ks = jax.random.split(key, 6)
    scale = 0.1
    w_ih = scale * jax.random.normal(ks[0], (4 * hidden_size, input_vocab_size), jnp.float32)
    w_hh = scale * jax.random.normal(ks[1], (4 * hidden_size, hidden_size), jnp.float32)
    b_ih = scale * jax.random.normal(ks[2], (4 * hidden_size,), jnp.float32)
    b_hh = scale * jax.random.normal(ks[3], (4 * hidden_size,), jnp.float32)
    w_dec = scale * jax.random.normal(ks[4], (output_vocab_size, hidden_size), jnp.float32)
    b_dec = scale * jax.random.normal(ks[5], (output_vocab_size,), jnp.float32)
    return {
        "w_ih_t": w_ih.T,                          # (V_in, 4H)
        "w_hh_t": w_hh.T,                          # (H, 4H)
        "b": (b_ih + b_hh).reshape(1, -1),         # (1, 4H)
        "w_dec_t": w_dec.T,                        # (H, V_out)
        "b_dec": b_dec.reshape(1, -1),             # (1, V_out)
    }


def reference_forward(inputs, params):
    """Pure-JAX reference (lax.scan LSTM) for correctness check."""
    B, T, Vin = inputs.shape
    H = params["w_hh_t"].shape[0]

    def step(carry, x_t):
        h, c = carry
        gates = x_t @ params["w_ih_t"] + h @ params["w_hh_t"] + params["b"]
        i = jax.nn.sigmoid(gates[:, 0 * H:1 * H])
        f = jax.nn.sigmoid(gates[:, 1 * H:2 * H])
        g = jnp.tanh(gates[:, 2 * H:3 * H])
        o = jax.nn.sigmoid(gates[:, 3 * H:4 * H])
        c = f * c + i * g
        h = o * jnp.tanh(c)
        return (h, c), None

    h0 = jnp.zeros((B, H), jnp.float32)
    c0 = jnp.zeros((B, H), jnp.float32)
    (h_T, _), _ = jax.lax.scan(step, (h0, c0), jnp.transpose(inputs, (1, 0, 2)))
    return h_T @ params["w_dec_t"] + params["b_dec"]


if __name__ == "__main__":
    hidden_size = 32
    input_vocab_size = 16
    output_vocab_size = 16
    B, T = 2, 8

    key = jax.random.PRNGKey(0)
    k_x, k_p = jax.random.split(key)

    inputs = jax.random.normal(k_x, (B, T, input_vocab_size), jnp.float32)
    input_mask = jnp.ones((B, T), jnp.float32)  # unused, as in the PyTorch forward
    params = init_params(k_p, hidden_size, input_vocab_size, output_vocab_size)

    out = encoder_decoder_forward(inputs, input_mask, params)
    out = jax.block_until_ready(out)

    ref = reference_forward(inputs, params)
    assert out.shape == (B, output_vocab_size)
    assert jnp.allclose(out, ref, atol=1e-5, rtol=1e-5), "mismatch vs JAX reference"

    print("KERNEL_OK")
</pallas_src>

<mosaic_0001>
module attributes {stable_mosaic.version = 11 : i64} {
  func.func @lstm_decoder_kernel(%arg0: memref<64x16xf32, #tpu.memory_space<vmem>>, %arg1: memref<16x128xf32, #tpu.memory_space<vmem>>, %arg2: memref<32x128xf32, #tpu.memory_space<vmem>>, %arg3: memref<1x128xf32, #tpu.memory_space<vmem>>, %arg4: memref<32x128xf32, #tpu.memory_space<vmem>>, %arg5: memref<1x128xf32, #tpu.memory_space<vmem>>, %arg6: memref<8x128xf32, #tpu.memory_space<vmem>>, %arg7: memref<64x128xf32, #tpu.memory_space<vmem>>) attributes {dimension_semantics = [], scalar_prefetch = 0 : i64, scratch_operands = 1 : i64, tpu.core_type = #tpu.core_type<tc>} {
    %c0 = arith.constant 0 : index
    %c0_0 = arith.constant 0 : index
    %0 = vector.load %arg0[%c0, %c0_0] : memref<64x16xf32, #tpu.memory_space<vmem>>, vector<64x16xf32>
    %c0_1 = arith.constant 0 : index
    %c0_2 = arith.constant 0 : index
    %1 = vector.load %arg1[%c0_1, %c0_2] : memref<16x128xf32, #tpu.memory_space<vmem>>, vector<16x128xf32>
    %cst = arith.constant dense<0.000000e+00> : vector<64x128xf32>
    %2 = tpu.matmul %0, %1, %cst {dimension_numbers = #tpu.dot_dimension_numbers<[1], [0], [0], [1], [0, 0, 1, 1], [], []>} : vector<64x16xf32>, vector<16x128xf32>, vector<64x128xf32> -> vector<64x128xf32>
    %c0_3 = arith.constant 0 : index
    %c0_4 = arith.constant 0 : index
    %3 = vector.load %arg3[%c0_3, %c0_4] : memref<1x128xf32, #tpu.memory_space<vmem>>, vector<1x128xf32>
    %4 = vector.broadcast %3 : vector<1x128xf32> to vector<64x128xf32>
    %5 = arith.addf %2, %4 : vector<64x128xf32>
    %c0_5 = arith.constant 0 : index
    %c0_6 = arith.constant 0 : index
    %6 = vector.load %arg7[%c0_5, %c0_6] : memref<64x128xf32, #tpu.memory_space<vmem>>, vector<64x128xf32>
    tpu.vector_store %arg7[%c0_5, %c0_6], %5 {strides = array<i32>} : memref<64x128xf32, #tpu.memory_space<vmem>>, vector<64x128xf32>,
    %c0_7 = arith.constant 0 : index
    %c0_8 = arith.constant 0 : index
    %7 = vector.load %arg2[%c0_7, %c0_8] : memref<32x128xf32, #tpu.memory_space<vmem>>, vector<32x128xf32>
    %c0_9 = arith.constant 0 : index
    %c0_10 = arith.constant 0 : index
    %8 = vector.load %arg7[%c0_9, %c0_10] : memref<64x128xf32, #tpu.memory_space<vmem>>, vector<8x128xf32>
    %9 = arith.negf %8 : vector<8x128xf32>
    %10 = math.exp %9 : vector<8x128xf32>
    %cst_11 = arith.constant 1.000000e+00 : f32
    %11 = vector.broadcast %cst_11 : f32 to vector<8x128xf32>
    %12 = arith.addf %11, %10 : vector<8x128xf32>
    %13 = arith.divf %11, %12 : vector<8x128xf32>
    %14 = math.tanh %8 : vector<8x128xf32>
    %15 = vector.extract_strided_slice %13 {offsets = [0, 0], sizes = [8, 32], strides = [1, 1]} : vector<8x128xf32> to vector<8x32xf32>
    %16 = vector.extract_strided_slice %14 {offsets = [0, 64], sizes = [8, 32], strides = [1, 1]} : vector<8x128xf32> to vector<8x32xf32>
    %17 = arith.mulf %15, %16 : vector<8x32xf32>
    %18 = vector.extract_strided_slice %13 {offsets = [0, 96], sizes = [8, 32], strides = [1, 1]} : vector<8x128xf32> to vector<8x32xf32>
    %19 = math.tanh %17 : vector<8x32xf32>
    %20 = arith.mulf %18, %19 : vector<8x32xf32>
    %c1_i32 = arith.constant 1 : i32
    %c8_i32 = arith.constant 8 : i32
    %21 = arith.muli %c1_i32, %c8_i32 : i32
    %22 = tpu.assume_multiple %21, 8 : i32
    %23 = arith.index_cast %22 : i32 to index
    %c0_12 = arith.constant 0 : index
    %24 = vector.load %arg7[%23, %c0_12] : memref<64x128xf32, #tpu.memory_space<vmem>>, vector<8x128xf32>
    %cst_13 = arith.constant dense<0.000000e+00> : vector<8x128xf32>
    %25 = tpu.matmul %20, %7, %cst_13 {dimension_numbers = #tpu.dot_dimension_numbers<[1], [0], [0], [1], [0, 0, 1, 1], [], []>} : vector<8x32xf32>, vector<32x128xf32>, vector<8x128xf32> -> vector<8x128xf32>
    %26 = arith.addf %24, %25 : vector<8x128xf32>
    %27 = arith.negf %26 : vector<8x128xf32>
    %28 = math.exp %27 : vector<8x128xf32>
    %cst_14 = arith.constant 1.000000e+00 : f32
    %29 = vector.broadcast %cst_14 : f32 to vector<8x128xf32>
    %30 = arith.addf %29, %28 : vector<8x128xf32>
    %31 = arith.divf %29, %30 : vector<8x128xf32>
    %32 = math.tanh %26 : vector<8x128xf32>
    %33 = vector.extract_strided_slice %31 {offsets = [0, 0], sizes = [8, 32], strides = [1, 1]} : vector<8x128xf32> to vector<8x32xf32>
    %34 = vector.extract_strided_slice %31 {offsets = [0, 32], sizes = [8, 32], strides = [1, 1]} : vector<8x128xf32> to vector<8x32xf32>
    %35 = vector.extract_strided_slice %31 {offsets = [0, 96], sizes = [8, 32], strides = [1, 1]} : vector<8x128xf32> to vector<8x32xf32>
    %36 = vector.extract_strided_slice %32 {offsets = [0, 64], sizes = [8, 32], strides = [1, 1]} : vector<8x128xf32> to vector<8x32xf32>
    %37 = arith.mulf %34, %17 : vector<8x32xf32>
    %38 = arith.mulf %33, %36 : vector<8x32xf32>
    %39 = arith.addf %37, %38 : vector<8x32xf32>
    %40 = math.tanh %39 : vector<8x32xf32>
    %41 = arith.mulf %35, %40 : vector<8x32xf32>
    %c2_i32 = arith.constant 2 : i32
    %c8_i32_15 = arith.constant 8 : i32
    %42 = arith.muli %c2_i32, %c8_i32_15 : i32
    %43 = tpu.assume_multiple %42, 8 : i32
    %44 = arith.index_cast %43 : i32 to index
    %c0_16 = arith.constant 0 : index
    %45 = vector.load %arg7[%44, %c0_16] : memref<64x128xf32, #tpu.memory_space<vmem>>, vector<8x128xf32>
    %cst_17 = arith.constant dense<0.000000e+00> : vector<8x128xf32>
    %46 = tpu.matmul %41, %7, %cst_17 {dimension_numbers = #tpu.dot_dimension_numbers<[1], [0], [0], [1], [0, 0, 1, 1], [], []>} : vector<8x32xf32>, vector<32x128xf32>, vector<8x128xf32> -> vector<8x128xf32>
    %47 = arith.addf %45, %46 : vector<8x128xf32>
    %48 = arith.negf %47 : vector<8x128xf32>
    %49 = math.exp %48 : vector<8x128xf32>
    %cst_18 = arith.constant 1.000000e+00 : f32
    %50 = vector.broadcast %cst_18 : f32 to vector<8x128xf32>
    %51 = arith.addf %50, %49 : vector<8x128xf32>
    %52 = arith.divf %50, %51 : vector<8x128xf32>
    %53 = math.tanh %47 : vector<8x128xf32>
    %54 = vector.extract_strided_slice %52 {offsets = [0, 0], sizes = [8, 32], strides = [1, 1]} : vector<8x128xf32> to vector<8x32xf32>
    %55 = vector.extract_strided_slice %52 {offsets = [0, 32], sizes = [8, 32], strides = [1, 1]} : vector<8x128xf32> to vector<8x32xf32>
    %56 = vector.extract_strided_slice %52 {offsets = [0, 96], sizes = [8, 32], strides = [1, 1]} : vector<8x128xf32> to vector<8x32xf32>
    %57 = vector.extract_strided_slice %53 {offsets = [0, 64], sizes = [8, 32], strides = [1, 1]} : vector<8x128xf32> to vector<8x32xf32>
    %58 = arith.mulf %55, %39 : vector<8x32xf32>
    %59 = arith.mulf %54, %57 : vector<8x32xf32>
    %60 = arith.addf %58, %59 : vector<8x32xf32>
    %61 = math.tanh %60 : vector<8x32xf32>
    %62 = arith.mulf %56, %61 : vector<8x32xf32>
    %c3_i32 = arith.constant 3 : i32
    %c8_i32_19 = arith.constant 8 : i32
    %63 = arith.muli %c3_i32, %c8_i32_19 : i32
    %64 = tpu.assume_multiple %63, 8 : i32
    %65 = arith.index_cast %64 : i32 to index
    %c0_20 = arith.constant 0 : index
    %66 = vector.load %arg7[%65, %c0_20] : memref<64x128xf32, #tpu.memory_space<vmem>>, vector<8x128xf32>
    %cst_21 = arith.constant dense<0.000000e+00> : vector<8x128xf32>
    %67 = tpu.matmul %62, %7, %cst_21 {dimension_numbers = #tpu.dot_dimension_numbers<[1], [0], [0], [1], [0, 0, 1, 1], [], []>} : vector<8x32xf32>, vector<32x128xf32>, vector<8x128xf32> -> vector<8x128xf32>
    %68 = arith.addf %66, %67 : vector<8x128xf32>
    %69 = arith.negf %68 : vector<8x128xf32>
    %70 = math.exp %69 : vector<8x128xf32>
    %cst_22 = arith.constant 1.000000e+00 : f32
    %71 = vector.broadcast %cst_22 : f32 to vector<8x128xf32>
    %72 = arith.addf %71, %70 : vector<8x128xf32>
    %73 = arith.divf %71, %72 : vector<8x128xf32>
    %74 = math.tanh %68 : vector<8x128xf32>
    %75 = vector.extract_strided_slice %73 {offsets = [0, 0], sizes = [8, 32], strides = [1, 1]} : vector<8x128xf32> to vector<8x32xf32>
    %76 = vector.extract_strided_slice %73 {offsets = [0, 32], sizes = [8, 32], strides = [1, 1]} : vector<8x128xf32> to vector<8x32xf32>
    %77 = vector.extract_strided_slice %73 {offsets = [0, 96], sizes = [8, 32], strides = [1, 1]} : vector<8x128xf32> to vector<8x32xf32>
    %78 = vector.extract_strided_slice %74 {offsets = [0, 64], sizes = [8, 32], strides = [1, 1]} : vector<8x128xf32> to vector<8x32xf32>
    %79 = arith.mulf %76, %60 : vector<8x32xf32>
    %80 = arith.mulf %75, %78 : vector<8x32xf32>
    %81 = arith.addf %79, %80 : vector<8x32xf32>
    %82 = math.tanh %81 : vector<8x32xf32>
    %83 = arith.mulf %77, %82 : vector<8x32xf32>
    %c4_i32 = arith.constant 4 : i32
    %c8_i32_23 = arith.constant 8 : i32
    %84 = arith.muli %c4_i32, %c8_i32_23 : i32
    %85 = tpu.assume_multiple %84, 8 : i32
    %86 = arith.index_cast %85 : i32 to index
    %c0_24 = arith.constant 0 : index
    %87 = vector.load %arg7[%86, %c0_24] : memref<64x128xf32, #tpu.memory_space<vmem>>, vector<8x128xf32>
    %cst_25 = arith.constant dense<0.000000e+00> : vector<8x128xf32>
    %88 = tpu.matmul %83, %7, %cst_25 {dimension_numbers = #tpu.dot_dimension_numbers<[1], [0], [0], [1], [0, 0, 1, 1], [], []>} : vector<8x32xf32>, vector<32x128xf32>, vector<8x128xf32> -> vector<8x128xf32>
    %89 = arith.addf %87, %88 : vector<8x128xf32>
    %90 = arith.negf %89 : vector<8x128xf32>
    %91 = math.exp %90 : vector<8x128xf32>
    %cst_26 = arith.constant 1.000000e+00 : f32
    %92 = vector.broadcast %cst_26 : f32 to vector<8x128xf32>
    %93 = arith.addf %92, %91 : vector<8x128xf32>
    %94 = arith.divf %92, %93 : vector<8x128xf32>
    %95 = math.tanh %89 : vector<8x128xf32>
    %96 = vector.extract_strided_slice %94 {offsets = [0, 0], sizes = [8, 32], strides = [1, 1]} : vector<8x128xf32> to vector<8x32xf32>
    %97 = vector.extract_strided_slice %94 {offsets = [0, 32], sizes = [8, 32], strides = [1, 1]} : vector<8x128xf32> to vector<8x32xf32>
    %98 = vector.extract_strided_slice %94 {offsets = [0, 96], sizes = [8, 32], strides = [1, 1]} : vector<8x128xf32> to vector<8x32xf32>
    %99 = vector.extract_strided_slice %95 {offsets = [0, 64], sizes = [8, 32], strides = [1, 1]} : vector<8x128xf32> to vector<8x32xf32>
    %100 = arith.mulf %97, %81 : vector<8x32xf32>
    %101 = arith.mulf %96, %99 : vector<8x32xf32>
    %102 = arith.addf %100, %101 : vector<8x32xf32>
    %103 = math.tanh %102 : vector<8x32xf32>
    %104 = arith.mulf %98, %103 : vector<8x32xf32>
    %c5_i32 = arith.constant 5 : i32
    %c8_i32_27 = arith.constant 8 : i32
    %105 = arith.muli %c5_i32, %c8_i32_27 : i32
    %106 = tpu.assume_multiple %105, 8 : i32
    %107 = arith.index_cast %106 : i32 to index
    %c0_28 = arith.constant 0 : index
    %108 = vector.load %arg7[%107, %c0_28] : memref<64x128xf32, #tpu.memory_space<vmem>>, vector<8x128xf32>
    %cst_29 = arith.constant dense<0.000000e+00> : vector<8x128xf32>
    %109 = tpu.matmul %104, %7, %cst_29 {dimension_numbers = #tpu.dot_dimension_numbers<[1], [0], [0], [1], [0, 0, 1, 1], [], []>} : vector<8x32xf32>, vector<32x128xf32>, vector<8x128xf32> -> vector<8x128xf32>
    %110 = arith.addf %108, %109 : vector<8x128xf32>
    %111 = arith.negf %110 : vector<8x128xf32>
    %112 = math.exp %111 : vector<8x128xf32>
    %cst_30 = arith.constant 1.000000e+00 : f32
    %113 = vector.broadcast %cst_30 : f32 to vector<8x128xf32>
    %114 = arith.addf %113, %112 : vector<8x128xf32>
    %115 = arith.divf %113, %114 : vector<8x128xf32>
    %116 = math.tanh %110 : vector<8x128xf32>
    %117 = vector.extract_strided_slice %115 {offsets = [0, 0], sizes = [8, 32], strides = [1, 1]} : vector<8x128xf32> to vector<8x32xf32>
    %118 = vector.extract_strided_slice %115 {offsets = [0, 32], sizes = [8, 32], strides = [1, 1]} : vector<8x128xf32> to vector<8x32xf32>
    %119 = vector.extract_strided_slice %115 {offsets = [0, 96], sizes = [8, 32], strides = [1, 1]} : vector<8x128xf32> to vector<8x32xf32>
    %120 = vector.extract_strided_slice %116 {offsets = [0, 64], sizes = [8, 32], strides = [1, 1]} : vector<8x128xf32> to vector<8x32xf32>
    %121 = arith.mulf %118, %102 : vector<8x32xf32>
    %122 = arith.mulf %117, %120 : vector<8x32xf32>
    %123 = arith.addf %121, %122 : vector<8x32xf32>
    %124 = math.tanh %123 : vector<8x32xf32>
    %125 = arith.mulf %119, %124 : vector<8x32xf32>
    %c6_i32 = arith.constant 6 : i32
    %c8_i32_31 = arith.constant 8 : i32
    %126 = arith.muli %c6_i32, %c8_i32_31 : i32
    %127 = tpu.assume_multiple %126, 8 : i32
    %128 = arith.index_cast %127 : i32 to index
    %c0_32 = arith.constant 0 : index
    %129 = vector.load %arg7[%128, %c0_32] : memref<64x128xf32, #tpu.memory_space<vmem>>, vector<8x128xf32>
    %cst_33 = arith.constant dense<0.000000e+00> : vector<8x128xf32>
    %130 = tpu.matmul %125, %7, %cst_33 {dimension_numbers = #tpu.dot_dimension_numbers<[1], [0], [0], [1], [0, 0, 1, 1], [], []>} : vector<8x32xf32>, vector<32x128xf32>, vector<8x128xf32> -> vector<8x128xf32>
    %131 = arith.addf %129, %130 : vector<8x128xf32>
    %132 = arith.negf %131 : vector<8x128xf32>
    %133 = math.exp %132 : vector<8x128xf32>
    %cst_34 = arith.constant 1.000000e+00 : f32
    %134 = vector.broadcast %cst_34 : f32 to vector<8x128xf32>
    %135 = arith.addf %134, %133 : vector<8x128xf32>
    %136 = arith.divf %134, %135 : vector<8x128xf32>
    %137 = math.tanh %131 : vector<8x128xf32>
    %138 = vector.extract_strided_slice %136 {offsets = [0, 0], sizes = [8, 32], strides = [1, 1]} : vector<8x128xf32> to vector<8x32xf32>
    %139 = vector.extract_strided_slice %136 {offsets = [0, 32], sizes = [8, 32], strides = [1, 1]} : vector<8x128xf32> to vector<8x32xf32>
    %140 = vector.extract_strided_slice %136 {offsets = [0, 96], sizes = [8, 32], strides = [1, 1]} : vector<8x128xf32> to vector<8x32xf32>
    %141 = vector.extract_strided_slice %137 {offsets = [0, 64], sizes = [8, 32], strides = [1, 1]} : vector<8x128xf32> to vector<8x32xf32>
    %142 = arith.mulf %139, %123 : vector<8x32xf32>
    %143 = arith.mulf %138, %141 : vector<8x32xf32>
    %144 = arith.addf %142, %143 : vector<8x32xf32>
    %145 = math.tanh %144 : vector<8x32xf32>
    %146 = arith.mulf %140, %145 : vector<8x32xf32>
    %c7_i32 = arith.constant 7 : i32
    %c8_i32_35 = arith.constant 8 : i32
    %147 = arith.muli %c7_i32, %c8_i32_35 : i32
    %148 = tpu.assume_multiple %147, 8 : i32
    %149 = arith.index_cast %148 : i32 to index
    %c0_36 = arith.constant 0 : index
    %150 = vector.load %arg7[%149, %c0_36] : memref<64x128xf32, #tpu.memory_space<vmem>>, vector<8x128xf32>
    %cst_37 = arith.constant dense<0.000000e+00> : vector<8x128xf32>
    %151 = tpu.matmul %146, %7, %cst_37 {dimension_numbers = #tpu.dot_dimension_numbers<[1], [0], [0], [1], [0, 0, 1, 1], [], []>} : vector<8x32xf32>, vector<32x128xf32>, vector<8x128xf32> -> vector<8x128xf32>
    %152 = arith.addf %150, %151 : vector<8x128xf32>
    %153 = arith.negf %152 : vector<8x128xf32>
    %154 = math.exp %153 : vector<8x128xf32>
    %cst_38 = arith.constant 1.000000e+00 : f32
    %155 = vector.broadcast %cst_38 : f32 to vector<8x128xf32>
    %156 = arith.addf %155, %154 : vector<8x128xf32>
    %157 = arith.divf %155, %156 : vector<8x128xf32>
    %158 = math.tanh %152 : vector<8x128xf32>
    %159 = vector.extract_strided_slice %157 {offsets = [0, 0], sizes = [8, 32], strides = [1, 1]} : vector<8x128xf32> to vector<8x32xf32>
    %160 = vector.extract_strided_slice %157 {offsets = [0, 32], sizes = [8, 32], strides = [1, 1]} : vector<8x128xf32> to vector<8x32xf32>
    %161 = vector.extract_strided_slice %157 {offsets = [0, 96], sizes = [8, 32], strides = [1, 1]} : vector<8x128xf32> to vector<8x32xf32>
    %162 = vector.extract_strided_slice %158 {offsets = [0, 64], sizes = [8, 32], strides = [1, 1]} : vector<8x128xf32> to vector<8x32xf32>
    %163 = arith.mulf %160, %144 : vector<8x32xf32>
    %164 = arith.mulf %159, %162 : vector<8x32xf32>
    %165 = arith.addf %163, %164 : vector<8x32xf32>
    %166 = math.tanh %165 : vector<8x32xf32>
    %167 = arith.mulf %161, %166 : vector<8x32xf32>
    %c7_i32_39 = arith.constant 7 : i32
    %c0_40 = arith.constant 0 : index
    %c0_41 = arith.constant 0 : index
    %168 = vector.load %arg4[%c0_40, %c0_41] : memref<32x128xf32, #tpu.memory_space<vmem>>, vector<32x128xf32>
    %cst_42 = arith.constant dense<0.000000e+00> : vector<8x128xf32>
    %169 = tpu.matmul %167, %168, %cst_42 {dimension_numbers = #tpu.dot_dimension_numbers<[1], [0], [0], [1], [0, 0, 1, 1], [], []>} : vector<8x32xf32>, vector<32x128xf32>, vector<8x128xf32> -> vector<8x128xf32>
    %c0_43 = arith.constant 0 : index
    %c0_44 = arith.constant 0 : index
    %170 = vector.load %arg5[%c0_43, %c0_44] : memref<1x128xf32, #tpu.memory_space<vmem>>, vector<1x128xf32>
    %171 = vector.broadcast %170 : vector<1x128xf32> to vector<8x128xf32>
    %172 = arith.addf %169, %171 : vector<8x128xf32>
    %c0_45 = arith.constant 0 : index
    %c0_46 = arith.constant 0 : index
    %173 = vector.load %arg6[%c0_45, %c0_46] : memref<8x128xf32, #tpu.memory_space<vmem>>, vector<8x128xf32>
    tpu.vector_store %arg6[%c0_45, %c0_46], %172 {strides = array<i32>} : memref<8x128xf32, #tpu.memory_space<vmem>>, vector<8x128xf32>,
    return
  }
}

</mosaic_0001>

<bundles_post_ra>
// kernel: tpu_custom_call.1
= control target key start
LH: loop header
LB: loop body
LE: loop exit
PB: predicated region body
PF: predicated region fallthrough
CT: control target
= control target key end

     0   :  { %vm41_vm0 = vcmask 130048   ;;  %s1548_s0 = inlined_call_operand.vmem [shape: f32[64,16], index: 0, kind: input, shape index: {}]   ;;  %s1549_s1 = inlined_call_operand.vmem [shape: f32[16,128], index: 1, kind: input, shape index: {}]   ;;  %s1550_s2 = inlined_call_operand.vmem [shape: f32[32,128], index: 2, kind: input, shape index: {}]   ;;  %s1551_s3 = inlined_call_operand.vmem [shape: f32[1,128], index: 3, kind: input, shape index: {}]   ;;  %s1552_s4 = inlined_call_operand.vmem [shape: f32[32,128], index: 4, kind: input, shape index: {}]   ;;  %s1553_s5 = inlined_call_operand.vmem [shape: f32[1,128], index: 5, kind: input, shape index: {}]   ;;  %s1554_s6 = inlined_call_operand.hbm [shape: f32[8,128], index: 6, kind: output, shape index: {}]  }
   0x1   :  { %v33_v0 = vld [vmem:[%s1549_s1 + $0x8] sm:$0xff]  ;;  %v32_v1 = vld [vmem:[%s1549_s1] sm:$0xff] }
   0x2   :  { %v24_v2 = vld [vmem:[%s1548_s0] sm:$0xff]  ;;  %1098 = vmatprep.subr.mxu0 %v33_v0 }
   0x3   :  { %1102 = vmatprep.mubr.msk.f32.mxu0 %vm41_vm0, %v24_v2 }
   0x4   :  { %11 = vsyncpa [#allocation4], 0  ;;  %1099 = vmatpush3.msra.mxu0 %v33_v0  ;;  %v25_v3 = vld [vmem:[%s1548_s0 + $0x8] sm:$0xff]  ;;  %v1352_v5 = vld [vmem:[%s1551_s3] ss:$0 sm:$0xff]  ;;  %s1294_s30 = smov 64  }
   0x5   :  { %1100 = vmatprep.subr.mxu0 %v32_v1  ;;  %v1359_v15 = vld [vmem:[%s1550_s2 + $0x18] sm:$0xff]  ;;  %v1295_v16 = vmov 0.0   ;;  %v1365_v17 = vld [vmem:[%s1550_s2 + $0x10] sm:$0xff]  ;;  %vm1296_vm1 = vmmov 0   ;;  %v1375_v18 = vld [vmem:[%s1550_s2 + $0x8] sm:$0xff]  ;;  %s1298_s14 = smov 32  }
   0x6   :  { %1101 = vmatpush3.msra.mxu0 %v32_v1  ;;  %1114 = vmatprep.subr.mxu1 %v1295_v16  ;;  %v1384_v19 = vld [vmem:[%s1550_s2] sm:$0xff]  ;;  %s1297_s2 = smov 96   ;;  %vm207_vm2 = vcmask 261120   ;;  %v26_v39 = vld [vmem:[%s1548_s0 + $0x10] sm:$0xff]  ;;  %v27_v40 = vld [vmem:[%s1548_s0 + $0x18] sm:$0xff]  ;;  %s1299_s11 = smov [#allocation3]  }
   0x7   :  { %1103 = vmatmul.mubr.msk.f32.vlgmr.msra.gmra.mxu0 %vm41_vm0, %v25_v3  ;;  %1122 = vmatprep.mubr.msk.f32.mxu1 %vm1296_vm1, %v1295_v16  ;;  %v28_v61 = vld [vmem:[%s1548_s0 + $0x20] sm:$0xff]  ;;  %v29_v62 = vld [vmem:[%s1548_s0 + $0x28] sm:$0xff]  ;;  %v30_v63 = vld [vmem:[%s1548_s0 + $0x30] sm:$0xff] }
   0x8   :  { %1115 = vmatpush3.msra.mxu1 %v1359_v15  ;;  %1136 = vmatprep.subr.mxu0 %v1295_v16  ;;  %v31_v0 = vld [vmem:[%s1548_s0 + $0x38] sm:$0xff] }
   0x9   :  { %1116 = vmatprep.subr.mxu1 %v1295_v16  ;;  %1137 = vmatpush3.msra.mxu0 %v1359_v15 }
   0xa   :  { %1117 = vmatpush3.msra.mxu1 %v1365_v17  ;;  %1138 = vmatprep.subr.mxu0 %v1295_v16 }
   0xb   :  { %1118 = vmatprep.subr.mxu1 %v1295_v16  ;;  %1139 = vmatpush3.msra.mxu0 %v1365_v17 }
   0xc   :  { %1119 = vmatpush3.msra.mxu1 %v1375_v18  ;;  %1140 = vmatprep.subr.mxu0 %v1295_v16 }
   0xd   :  { %1120 = vmatprep.subr.mxu1 %v1295_v16  ;;  %1141 = vmatpush3.msra.mxu0 %v1375_v18 }
   0xe   :  { %1121 = vmatpush3.msra.mxu1 %v1384_v19  ;;  %1142 = vmatprep.subr.mxu0 %v1295_v16 }
   0xf   :  { %1125 = vmatprep.subr.mxu1 %v1295_v16  ;;  %1143 = vmatpush3.msra.mxu0 %v1384_v19 }
  0x10   :  { %1158 = vmatprep.subr.mxu0 %v1295_v16  ;;  %1105 = vmatprep.mubr.msk.f32.mxu0 %vm41_vm0, %v26_v39 }
  0x11   :  { %1106 = vmatmul.mubr.msk.f32.gmra.mxu0 %vm41_vm0, %v27_v40 }
  0x12   :  { %1108 = vmatprep.mubr.msk.f32.mxu0 %vm41_vm0, %v28_v61 }
  0x15   :  { %1109 = vmatmul.mubr.msk.f32.gmra.mxu0 %vm41_vm0, %v29_v62 }
  0x16   :  { %1111 = vmatprep.mubr.msk.f32.mxu0 %vm41_vm0, %v30_v63 }
  0x19   :  { %1112 = vmatmul.mubr.msk.f32.gmra.mxu0 %vm41_vm0, %v31_v0 }
  0x1a   :  { %1144 = vmatprep.mubr.msk.f32.mxu0 %vm1296_vm1, %v1295_v16 }
  0xc7   :  { %v1104_v4 = vpop.f32.mrf.mxu0 }
  0xc8   :  { %v138_v24 = vadd.f32 %v1104_v4, %v1352_v5 }
  0xc9   :  { %v132_v6 = vpop.f32.mrf.mxu0 }
  0xca   :  { %v133_v7 = vadd.f32 %v1352_v5, %v132_v6 }
  0xcc   :  { %1208 = vtanh.f32 %v133_v7  ;;  %v1031_v9 = vmul.f32 -1.442695, %v133_v7 }
  0xce   :  { %1210 = vpow2.f32 %v1031_v9 }
  0xd1   :  { %v1107_v45 = vpop.f32.mrf.mxu0 }
  0xd3   :  { %v142_v46 = vpop.f32.mrf.mxu0 }
  0xd4   :  { %v143_v47 = vadd.f32 %v1352_v5, %v142_v46 }
  0xd5   :  { %v1467_v6 = vpop.f32.mrf.mxu0 }
  0xd7   :  { %v152_v7 = vpop.f32.mrf.mxu0 }
  0xd9   :  { %v1209_v8 = vpop.eup %1208 }
  0xda   :  { %192 = vrot.lane.b32.xlu0 %v1209_v8, %s1294_s30  ;;  %v1469_v8 = vpop.f32.mrf.mxu0 }
  0xdb   :  { %v1211_v10 = vpop.eup %1210 }
  0xdc   :  { %v187_v11 = vadd.f32 1.0, %v1211_v10  ;;  %v1471_v9 = vpop.f32.mrf.mxu0  ;;  %v148_v10 = vadd.f32 %v1107_v45, %v1352_v5 }
  0xde   :  { %1212 = vrcp.f32 %v187_v11 }
  0xeb   :  { %v1213_v12 = vpop.eup %1212 }
 0x14c   :  { %v193_v13 = vpop.permute.xlu0 %192 }
 0x14d   :  { %v195_v14 = vmul.f32 %v1213_v12, %v193_v13 }
 0x14f   :  { %1214 = vtanh.f32 %v195_v14 }
 0x15c   :  { %v1215_v20 = vpop.eup %1214 }
 0x15d   :  { %198 = vrot.lane.b32.xlu0 %v1215_v20, %s1297_s2 }
 0x161   :  { %289 = vrot.lane.b32.xlu0 %v195_v14, %s1298_s14 }
 0x1cf   :  { %v199_v21 = vpop.permute.xlu0 %198 }
 0x1d0   :  { %v201_v22 = vmul.f32 %v1213_v12, %v199_v21 }
 0x1d2   :  { %205 = vrot.lane.b32.xlu1 %v201_v22, %s1298_s14 }
 0x1d3   :  { %v290_v35 = vpop.permute.xlu0 %289 }
 0x244   :  { %v206_v23 = vpop.permute.xlu1 %205 }
 0x245   :  { %1123 = vmatmul.mubr.msk.f32.vlgmr.msra.gmra.mxu1 %vm207_vm2, %v206_v23 }
 0x246   :  { %1126 = vmatpush3.msra.mxu1 %v1359_v15  ;;  %1133 = vmatprep.mubr.msk.f32.mxu1 %vm1296_vm1, %v1295_v16 }
 0x247   :  { %1127 = vmatprep.subr.mxu1 %v1295_v16 }
 0x248   :  { %1128 = vmatpush3.msra.mxu1 %v1365_v17 }
 0x249   :  { %1129 = vmatprep.subr.mxu1 %v1295_v16 }
 0x24a   :  { %1130 = vmatpush3.msra.mxu1 %v1375_v18 }
 0x24b   :  { %1131 = vmatprep.subr.mxu1 %v1295_v16 }
 0x24c   :  { %1132 = vmatpush3.msra.mxu1 %v1384_v19 }
 0x24d   :  { %1147 = vmatprep.subr.mxu1 %v1295_v16 }
 0x305   :  { %v276_v25 = vpop.f32.mrf.mxu1 }
 0x306   :  { %v280_v26 = vadd.f32 %v276_v25, %v138_v24 }
 0x307   :  { %v1124_v27 = vpop.f32.mrf.mxu1 }
 0x308   :  { %1216 = vtanh.f32 %v280_v26  ;;  %v1033_v29 = vmul.f32 -1.442695, %v280_v26 }
 0x30a   :  { %1218 = vpow2.f32 %v1033_v29 }
 0x315   :  { %v1217_v28 = vpop.eup %1216 }
 0x316   :  { %294 = vrot.lane.b32.xlu1 %v1217_v28, %s1294_s30 }
 0x317   :  { %v1219_v30 = vpop.eup %1218 }
 0x318   :  { %v284_v31 = vadd.f32 1.0, %v1219_v30 }
 0x31a   :  { %1220 = vrcp.f32 %v284_v31 }
 0x327   :  { %v1221_v32 = vpop.eup %1220 }
 0x328   :  { %v292_v36 = vmul.f32 %v1221_v32, %v290_v35 }
 0x388   :  { %v295_v33 = vpop.permute.xlu1 %294 }
 0x389   :  { %v297_v34 = vmul.f32 %v1221_v32, %v295_v33  ;;  %v153_v33 = vadd.f32 %v1352_v5, %v152_v7 }
 0x38b   :  { %299 = vrot.lane.b32.xlu1 %v297_v34, %s1298_s14 }
 0x3fd   :  { %v300_v37 = vpop.permute.xlu1 %299 }
 0x3fe   :  { %v302_v38 = vadd.f32 %v300_v37, %v292_v36 }
 0x400   :  { %1222 = vtanh.f32 %v302_v38 }
 0x40d   :  { %v1223_v41 = vpop.eup %1222 }
 0x40e   :  { %305 = vrot.lane.b32.xlu0 %v1223_v41, %s1294_s30 }
 0x480   :  { %v306_v42 = vpop.permute.xlu0 %305 }
 0x481   :  { %v308_v43 = vmul.f32 %v1221_v32, %v306_v42 }
 0x483   :  { %312 = vrot.lane.b32.xlu1 %v308_v43, %s1298_s14 }
 0x4f5   :  { %v313_v44 = vpop.permute.xlu1 %312 }
 0x4f6   :  { %1134 = vmatmul.mubr.msk.f32.vlgmr.msra.gmra.mxu1 %vm207_vm2, %v313_v44 }
 0x4f7   :  { %1148 = vmatpush3.msra.mxu1 %v1359_v15  ;;  %1155 = vmatprep.mubr.msk.f32.mxu1 %vm1296_vm1, %v1295_v16 }
 0x4f8   :  { %1149 = vmatprep.subr.mxu1 %v1295_v16 }
 0x4f9   :  { %1150 = vmatpush3.msra.mxu1 %v1365_v17 }
 0x4fa   :  { %1151 = vmatprep.subr.mxu1 %v1295_v16 }
 0x4fb   :  { %1152 = vmatpush3.msra.mxu1 %v1375_v18 }
 0x4fc   :  { %1153 = vmatprep.subr.mxu1 %v1295_v16 }
 0x4fd   :  { %1154 = vmatpush3.msra.mxu1 %v1384_v19 }
 0x4fe   :  { %1169 = vmatprep.subr.mxu1 %v1295_v16 }
 0x5b6   :  { %v382_v48 = vpop.f32.mrf.mxu1 }
 0x5b7   :  { %v386_v49 = vadd.f32 %v382_v48, %v143_v47 }
 0x5b8   :  { %v1135_v50 = vpop.f32.mrf.mxu1 }
 0x5b9   :  { %1224 = vtanh.f32 %v386_v49  ;;  %v1035_v52 = vmul.f32 -1.442695, %v386_v49 }
 0x5bb   :  { %1226 = vpow2.f32 %v1035_v52 }
 0x5c6   :  { %v1225_v51 = vpop.eup %1224 }
 0x5c7   :  { %396 = vrot.lane.b32.xlu0 %v1225_v51, %s1294_s30  ;;  %v158_v51 = vadd.f32 %v1467_v6, %v1352_v5 }
 0x5c8   :  { %v1227_v53 = vpop.eup %1226 }
 0x5c9   :  { %v390_v54 = vadd.f32 1.0, %v1227_v53 }
 0x5cb   :  { %1228 = vrcp.f32 %v390_v54 }
 0x5d8   :  { %v1229_v55 = vpop.eup %1228 }
 0x5d9   :  { %v394_v58 = vmul.f32 %v1229_v55, %v302_v38 }
 0x639   :  { %v397_v56 = vpop.permute.xlu0 %396 }
 0x63a   :  { %v399_v57 = vmul.f32 %v1229_v55, %v397_v56 }
 0x63c   :  { %401 = vrot.lane.b32.xlu1 %v399_v57, %s1298_s14 }
 0x6ae   :  { %v402_v59 = vpop.permute.xlu1 %401 }
 0x6af   :  { %v404_v60 = vadd.f32 %v402_v59, %v394_v58 }
 0x6b1   :  { %1230 = vtanh.f32 %v404_v60 }
 0x6be   :  { %v1231_v1 = vpop.eup %1230 }
 0x6bf   :  { %407 = vrot.lane.b32.xlu0 %v1231_v1, %s1294_s30  ;;  %v163_v1 = vadd.f32 %v1352_v5, %v1471_v9 }
 0x731   :  { %v408_v2 = vpop.permute.xlu0 %407 }
 0x732   :  { %v410_v3 = vmul.f32 %v1229_v55, %v408_v2 }
 0x734   :  { %414 = vrot.lane.b32.xlu1 %v410_v3, %s1298_s14 }
 0x7a6   :  { %v415_v4 = vpop.permute.xlu1 %414 }
 0x7a7   :  { %1145 = vmatmul.mubr.msk.f32.vlgmr.msra.gmra.mxu0 %vm207_vm2, %v415_v4 }
 0x7a8   :  { %1159 = vmatpush3.msra.mxu0 %v1359_v15  ;;  %1166 = vmatprep.mubr.msk.f32.mxu0 %vm1296_vm1, %v1295_v16 }
 0x7a9   :  { %1160 = vmatprep.subr.mxu0 %v1295_v16 }
 0x7aa   :  { %1161 = vmatpush3.msra.mxu0 %v1365_v17 }
 0x7ab   :  { %1162 = vmatprep.subr.mxu0 %v1295_v16 }
 0x7ac   :  { %1163 = vmatpush3.msra.mxu0 %v1375_v18 }
 0x7ad   :  { %1164 = vmatprep.subr.mxu0 %v1295_v16 }
 0x7ae   :  { %1165 = vmatpush3.msra.mxu0 %v1384_v19 }
 0x7af   :  { %1180 = vmatprep.subr.mxu0 %v1295_v16 }
 0x867   :  { %v484_v11 = vpop.f32.mrf.mxu0 }
 0x868   :  { %v488_v12 = vadd.f32 %v484_v11, %v148_v10 }
 0x869   :  { %v1146_v13 = vpop.f32.mrf.mxu0 }
 0x86a   :  { %1232 = vtanh.f32 %v488_v12  ;;  %v1037_v20 = vmul.f32 -1.442695, %v488_v12 }
 0x86c   :  { %1234 = vpow2.f32 %v1037_v20 }
 0x877   :  { %v1233_v14 = vpop.eup %1232 }
 0x878   :  { %498 = vrot.lane.b32.xlu0 %v1233_v14, %s1294_s30 }
 0x879   :  { %v1235_v21 = vpop.eup %1234 }
 0x87a   :  { %v492_v22 = vadd.f32 1.0, %v1235_v21 }
 0x87c   :  { %1236 = vrcp.f32 %v492_v22 }
 0x889   :  { %v1237_v23 = vpop.eup %1236 }
 0x88a   :  { %v496_v26 = vmul.f32 %v1237_v23, %v404_v60 }
 0x8ea   :  { %v499_v24 = vpop.permute.xlu0 %498 }
 0x8eb   :  { %v501_v25 = vmul.f32 %v1237_v23, %v499_v24 }
 0x8ed   :  { %503 = vrot.lane.b32.xlu1 %v501_v25, %s1298_s14 }
 0x95f   :  { %v504_v27 = vpop.permute.xlu1 %503 }
 0x960   :  { %v506_v28 = vadd.f32 %v504_v27, %v496_v26  ;;  %v168_v26 = vadd.f32 %v1469_v8, %v1352_v5  ;;  %v924_v8 = vld [vmem:[%s1552_s4 + $0x18] sm:$0xff] }
 0x962   :  { %1238 = vtanh.f32 %v506_v28 }
 0x96f   :  { %v1239_v29 = vpop.eup %1238 }
 0x970   :  { %509 = vrot.lane.b32.xlu0 %v1239_v29, %s1294_s30 }
 0x9e2   :  { %v510_v30 = vpop.permute.xlu0 %509 }
 0x9e3   :  { %v512_v31 = vmul.f32 %v1237_v23, %v510_v30 }
 0x9e5   :  { %516 = vrot.lane.b32.xlu1 %v512_v31, %s1298_s14 }
 0xa57   :  { %v517_v32 = vpop.permute.xlu1 %516 }
 0xa58   :  { %1156 = vmatmul.mubr.msk.f32.vlgmr.msra.gmra.mxu1 %vm207_vm2, %v517_v32 }
 0xa59   :  { %1170 = vmatpush3.msra.mxu1 %v1359_v15  ;;  %1177 = vmatprep.mubr.msk.f32.mxu1 %vm1296_vm1, %v1295_v16 }
 0xa5a   :  { %1171 = vmatprep.subr.mxu1 %v1295_v16 }
 0xa5b   :  { %1172 = vmatpush3.msra.mxu1 %v1365_v17 }
 0xa5c   :  { %1173 = vmatprep.subr.mxu1 %v1295_v16 }
 0xa5d   :  { %1174 = vmatpush3.msra.mxu1 %v1375_v18 }
 0xa5e   :  { %1175 = vmatprep.subr.mxu1 %v1295_v16 }
 0xa5f   :  { %1176 = vmatpush3.msra.mxu1 %v1384_v19 }
 0xa60   :  { %1191 = vmatprep.subr.mxu1 %v1295_v16 }
 0xb18   :  { %v586_v34 = vpop.f32.mrf.mxu1 }
 0xb19   :  { %v590_v35 = vadd.f32 %v586_v34, %v153_v33 }
 0xb1a   :  { %v1157_v36 = vpop.f32.mrf.mxu1 }
 0xb1b   :  { %1240 = vtanh.f32 %v590_v35  ;;  %v1039_v38 = vmul.f32 -1.442695, %v590_v35 }
 0xb1d   :  { %1242 = vpow2.f32 %v1039_v38 }
 0xb28   :  { %v1241_v37 = vpop.eup %1240 }
 0xb29   :  { %600 = vrot.lane.b32.xlu0 %v1241_v37, %s1294_s30 }
 0xb2a   :  { %v1243_v39 = vpop.eup %1242 }
 0xb2b   :  { %v594_v40 = vadd.f32 1.0, %v1243_v39  ;;  %v923_v39 = vld [vmem:[%s1552_s4 + $0x10] sm:$0xff] }
 0xb2d   :  { %1244 = vrcp.f32 %v594_v40  ;;  %v922_v40 = vld [vmem:[%s1552_s4 + $0x8] sm:$0xff] }
 0xb3a   :  { %v1245_v41 = vpop.eup %1244 }
 0xb3b   :  { %v598_v44 = vmul.f32 %v1245_v41, %v506_v28 }
 0xb9b   :  { %v601_v42 = vpop.permute.xlu0 %600 }
 0xb9c   :  { %v603_v43 = vmul.f32 %v1245_v41, %v601_v42 }
 0xb9e   :  { %605 = vrot.lane.b32.xlu1 %v603_v43, %s1298_s14 }
 0xc10   :  { %v606_v45 = vpop.permute.xlu1 %605 }
 0xc11   :  { %v608_v46 = vadd.f32 %v606_v45, %v598_v44 }
 0xc13   :  { %1246 = vtanh.f32 %v608_v46 }
 0xc20   :  { %v1247_v47 = vpop.eup %1246 }
 0xc21   :  { %611 = vrot.lane.b32.xlu0 %v1247_v47, %s1294_s30 }
 0xc93   :  { %v612_v48 = vpop.permute.xlu0 %611 }
 0xc94   :  { %v614_v49 = vmul.f32 %v1245_v41, %v612_v48  ;;  %v921_v41 = vld [vmem:[%s1552_s4] sm:$0xff]  ;;  %s1014_s4 = sshll.u32 %s1299_s11, 4  ;;  %s1015_s4 = int_to_ptr.vmem [resolvable:$true] %s1014_s4 }
 0xc95   :  { %s1272_s12 = scalar_lea.vmem %s1015_s4, 128  ;;  %p1277_p1 = scmp.lt.s32.totalorder %s1015_s4, %s1015_s4 }
 0xc96   :  { %618 = vrot.lane.b32.xlu1 %v614_v49, %s1298_s14  ;;  %p1273_p0 = scmp.ne.s32.totalorder %s1015_s4, %s1272_s12  ;;  %p1278_p2 = scmp.lt.s32.totalorder %s1272_s12, %s1272_s12 }
 0xc98   :  { %p1279_p3 = por %p1278_p2, %p1277_p1 }
 0xc9a   :  { %p1280_p4 = pnand %p1279_p3, %p1273_p0 }
 0xd08   :  { %v619_v50 = vpop.permute.xlu1 %618 }
 0xd09   :  { %1167 = vmatmul.mubr.msk.f32.vlgmr.msra.gmra.mxu0 %vm207_vm2, %v619_v50 }
 0xd0a   :  { %1181 = vmatpush3.msra.mxu0 %v1359_v15  ;;  %1188 = vmatprep.mubr.msk.f32.mxu0 %vm1296_vm1, %v1295_v16 }
 0xd0b   :  { %1182 = vmatprep.subr.mxu0 %v1295_v16 }
 0xd0c   :  { %1183 = vmatpush3.msra.mxu0 %v1365_v17 }
 0xd0d   :  { %1184 = vmatprep.subr.mxu0 %v1295_v16 }
 0xd0e   :  { %1185 = vmatpush3.msra.mxu0 %v1375_v18 }
 0xd0f   :  { %1186 = vmatprep.subr.mxu0 %v1295_v16 }
 0xd10   :  { %1187 = vmatpush3.msra.mxu0 %v1384_v19 }
 0xdc9   :  { %v688_v52 = vpop.f32.mrf.mxu0 }
 0xdca   :  { %v692_v15 = vadd.f32 %v688_v52, %v158_v51 }
 0xdcb   :  { %v1168_v53 = vpop.f32.mrf.mxu0 }
 0xdcc   :  { %1248 = vtanh.f32 %v692_v15  ;;  %v1041_v55 = vmul.f32 -1.442695, %v692_v15 }
 0xdce   :  { %1250 = vpow2.f32 %v1041_v55 }
 0xdd9   :  { %v1249_v54 = vpop.eup %1248 }
 0xdda   :  { %702 = vrot.lane.b32.xlu0 %v1249_v54, %s1294_s30 }
 0xddb   :  { %v1251_v17 = vpop.eup %1250 }
 0xddc   :  { %v696_v56 = vadd.f32 1.0, %v1251_v17 }
 0xdde   :  { %1252 = vrcp.f32 %v696_v56 }
 0xdeb   :  { %v1253_v18 = vpop.eup %1252 }
 0xdec   :  { %v700_v19 = vmul.f32 %v1253_v18, %v608_v46  ;;  %v1046_v46 = vld [vmem:[%s1553_s5] ss:$0 sm:$0xff] }
 0xe4c   :  { %v703_v57 = vpop.permute.xlu0 %702 }
 0xe4d   :  { %v705_v58 = vmul.f32 %v1253_v18, %v703_v57 }
 0xe4f   :  { %707 = vrot.lane.b32.xlu1 %v705_v58, %s1298_s14 }
 0xec1   :  { %v708_v59 = vpop.permute.xlu1 %707 }
 0xec2   :  { %v710_v60 = vadd.f32 %v708_v59, %v700_v19 }
 0xec4   :  { %1254 = vtanh.f32 %v710_v60 }
 0xed1   :  { %v1255_v61 = vpop.eup %1254 }
 0xed2   :  { %713 = vrot.lane.b32.xlu0 %v1255_v61, %s1294_s30 }
 0xf44   :  { %v714_v62 = vpop.permute.xlu0 %713 }
 0xf45   :  { %v716_v63 = vmul.f32 %v1253_v18, %v714_v62 }
 0xf47   :  { %720 = vrot.lane.b32.xlu1 %v716_v63, %s1298_s14 }
 0xfb9   :  { %v721_v0 = vpop.permute.xlu1 %720 }
 0xfba   :  { %1178 = vmatmul.mubr.msk.f32.vlgmr.msra.gmra.mxu1 %vm207_vm2, %v721_v0 }
 0xfbb   :  { %1199 = vmatprep.mubr.msk.f32.mxu1 %vm1296_vm1, %v1295_v16  ;;  %1192 = vmatpush3.msra.mxu1 %v924_v8 }
 0xfbc   :  { %1193 = vmatprep.subr.mxu1 %v1295_v16 }
 0xfbd   :  { %1194 = vmatpush3.msra.mxu1 %v923_v39 }
 0xfbe   :  { %1195 = vmatprep.subr.mxu1 %v1295_v16 }
 0xfbf   :  { %1196 = vmatpush3.msra.mxu1 %v922_v40 }
 0xfc0   :  { %1197 = vmatprep.subr.mxu1 %v1295_v16 }
 0xfc1   :  { %1198 = vmatpush3.msra.mxu1 %v921_v41 }
0x107a   :  { %v790_v2 = vpop.f32.mrf.mxu1 }
0x107b   :  { %v794_v3 = vadd.f32 %v790_v2, %v163_v1 }
0x107c   :  { %v1179_v4 = vpop.f32.mrf.mxu1 }
0x107d   :  { %1256 = vtanh.f32 %v794_v3  ;;  %v1043_v7 = vmul.f32 -1.442695, %v794_v3 }
0x107f   :  { %1258 = vpow2.f32 %v1043_v7 }
0x108a   :  { %v1257_v6 = vpop.eup %1256 }
0x108b   :  { %804 = vrot.lane.b32.xlu0 %v1257_v6, %s1294_s30 }
0x108c   :  { %v1259_v10 = vpop.eup %1258 }
0x108d   :  { %v798_v11 = vadd.f32 1.0, %v1259_v10 }
0x108f   :  { %1260 = vrcp.f32 %v798_v11 }
0x109c   :  { %v1261_v12 = vpop.eup %1260 }
0x109d   :  { %v802_v20 = vmul.f32 %v1261_v12, %v710_v60 }
0x10fd   :  { %v805_v13 = vpop.permute.xlu0 %804 }
0x10fe   :  { %v807_v14 = vmul.f32 %v1261_v12, %v805_v13 }
0x1100   :  { %809 = vrot.lane.b32.xlu1 %v807_v14, %s1298_s14 }
0x1172   :  { %v810_v21 = vpop.permute.xlu1 %809 }
0x1173   :  { %v812_v9 = vadd.f32 %v810_v21, %v802_v20 }
0x1175   :  { %1262 = vtanh.f32 %v812_v9 }
0x1182   :  { %v1263_v22 = vpop.eup %1262 }
0x1183   :  { %815 = vrot.lane.b32.xlu0 %v1263_v22, %s1294_s30 }
0x11f5   :  { %v816_v23 = vpop.permute.xlu0 %815 }
0x11f6   :  { %v818_v24 = vmul.f32 %v1261_v12, %v816_v23 }
0x11f8   :  { %822 = vrot.lane.b32.xlu1 %v818_v24, %s1298_s14 }
0x126a   :  { %v823_v25 = vpop.permute.xlu1 %822 }
0x126b   :  { %1189 = vmatmul.mubr.msk.f32.vlgmr.msra.gmra.mxu0 %vm207_vm2, %v823_v25 }
0x132b   :  { %v892_v27 = vpop.f32.mrf.mxu0 }
0x132c   :  { %v896_v28 = vadd.f32 %v892_v27, %v168_v26 }
0x132d   :  { %v1190_v29 = vpop.f32.mrf.mxu0 }
0x132e   :  { %1264 = vtanh.f32 %v896_v28  ;;  %v1045_v31 = vmul.f32 -1.442695, %v896_v28 }
0x1330   :  { %1266 = vpow2.f32 %v1045_v31 }
0x133b   :  { %v1265_v30 = vpop.eup %1264 }
0x133c   :  { %906 = vrot.lane.b32.xlu0 %v1265_v30, %s1294_s30 }
0x133d   :  { %v1267_v32 = vpop.eup %1266 }
0x133e   :  { %v900_v33 = vadd.f32 1.0, %v1267_v32 }
0x1340   :  { %1268 = vrcp.f32 %v900_v33 }
0x134d   :  { %v1269_v34 = vpop.eup %1268 }
0x134e   :  { %v904_v37 = vmul.f32 %v1269_v34, %v812_v9 }
0x13ae   :  { %v907_v35 = vpop.permute.xlu0 %906 }
0x13af   :  { %v909_v36 = vmul.f32 %v1269_v34, %v907_v35 }
0x13b1   :  { %911 = vrot.lane.b32.xlu1 %v909_v36, %s1298_s14 }
0x1423   :  { %v912_v38 = vpop.permute.xlu1 %911 }
0x1424   :  { %v914_v5 = vadd.f32 %v912_v38, %v904_v37 }
0x1426   :  { %1270 = vtanh.f32 %v914_v5 }
0x1433   :  { %v1271_v42 = vpop.eup %1270 }
0x1434   :  { %917 = vrot.lane.b32.xlu0 %v1271_v42, %s1294_s30 }
0x14a6   :  { %v918_v43 = vpop.permute.xlu0 %917 }
0x14a7   :  { %v920_v44 = vmul.f32 %v1269_v34, %v918_v43 }
0x14a9   :  { %933 = vrot.lane.b32.xlu1 %v920_v44, %s1298_s14 }
0x151b   :  { %v934_v45 = vpop.permute.xlu1 %933 }
0x151c   :  { %1200 = vmatmul.mubr.msk.f32.vlgmr.msra.gmra.mxu1 %vm207_vm2, %v934_v45 }
0x15dc   :  { %v1003_v47 = vpop.f32.mrf.mxu1 }
0x15dd   :  { %v1004_v48 = vadd.f32 %v1046_v46, %v1003_v47 }
0x15de   :  { %v1201_v16 = vpop.f32.mrf.mxu1 }
0x15df   :  { %1007 = vst [vmem:[#allocation3] sm:$0xff] %v1004_v48 }
0x15e0   :  { %1283 = shalt.err (!%p1280_p4)
}
0x15e1   :  { %1017 = dma.vmem_to_hbm [thread:$0]  %s1015_s4, 128, %s1554_s6, [#allocation4]  }
0x15e2   :  { %1292 = dma.done.wait [#allocation4], 128  }
0x15e3   :  { %1293 = vsyncadd [#allocation4], 4294967168 }
0x15e4   :  { %1021 = vsyncpa [#allocation4], 1 }

</bundles_post_ra>
